<compile_context>
chip_gen: v7x
topology: tpu7x:2x2x1
jax: 0.10.0
libtpu: 0.0.40
codegen_flags: <defaults>
</compile_context>

<pallas_src>
import jax
import jax.numpy as jnp
from jax.experimental import pallas as pl
from jax.experimental.pallas import tpu as pltpu

NEG_SLOPE = 0.33   # nn.LeakyReLU(negative_slope=0.33)
BN_EPS = 1e-5      # nn.BatchNorm1d default eps


def _lrelu(v):
    # Valid rewrite of LeakyReLU since 0 < slope < 1: max(v, slope*v).
    return jnp.maximum(v, NEG_SLOPE * v)


def _mlp_tail(h_f32, w2_ref, w3_ref, pvec_ref, o_ref, out_n):
    """linear2 + LeakyReLU + linear3 + store (shared by both kernels)."""
    b2 = pvec_ref[3:4, :]
    b3 = pvec_ref[4:5, :out_n]
    g = jnp.dot(h_f32.astype(w2_ref.dtype), w2_ref[...],
                preferred_element_type=jnp.float32) + b2
    g = _lrelu(g)
    y = jnp.dot(g.astype(w3_ref.dtype), w3_ref[...],
                preferred_element_type=jnp.float32) + b3
    # final = Identity  =>  cat([y[:, :3], y[:, 3:]], dim=1) == y
    o_ref[...] = y.astype(o_ref.dtype)


# ----------------------------------------------------------------------------
# Fused whole-batch kernel (small / medium N): one pallas_call, no grid.
# ----------------------------------------------------------------------------
def _make_fused_kernel(n_rows, apply_bn, out_n):
    inv_n = 1.0 / float(n_rows)

    def kernel(x_ref, w1_ref, w2_ref, w3_ref, pvec_ref, o_ref):
        b1 = pvec_ref[0:1, :]
        h = jnp.dot(x_ref[...], w1_ref[...],
                    preferred_element_type=jnp.float32) + b1
        h = _lrelu(h)
        if apply_bn:
            # Whole batch is resident -> centered (numerically safe) variance.
            mean = jnp.sum(h, axis=0, keepdims=True) * inv_n
            d = h - mean
            var = jnp.sum(d * d, axis=0, keepdims=True) * inv_n
            g2 = pvec_ref[1:2, :]
            bt2 = pvec_ref[2:3, :]
            h = d * jax.lax.rsqrt(var + BN_EPS) * g2 + bt2
        _mlp_tail(h, w2_ref, w3_ref, pvec_ref, o_ref, out_n)

    return kernel


# ----------------------------------------------------------------------------
# Tiled path (large N): stats kernel + single-phase main kernel.
# ----------------------------------------------------------------------------
def _make_stats_kernel(n_rows, tn):
    def kernel(x_ref, w1_ref, pvec_ref, stats_ref):
        t = pl.program_id(0)

        @pl.when(t == 0)
        def _init():
            stats_ref[...] = jnp.zeros_like(stats_ref)

        h = jnp.dot(x_ref[...], w1_ref[...],
                    preferred_element_type=jnp.float32) + pvec_ref[0:1, :]
        h = _lrelu(h)
        # Mask zero-padded rows so they don't pollute the batch statistics.
        row = t * tn + jax.lax.broadcasted_iota(jnp.int32, (tn, 1), 0)
        hm = jnp.where(row < n_rows, h, 0.0)
        stats_ref[0:1, :] += jnp.sum(hm, axis=0, keepdims=True)
        stats_ref[1:2, :] += jnp.sum(hm * hm, axis=0, keepdims=True)

    return kernel


def _make_main_kernel(n_rows, out_n):
    inv_n = 1.0 / float(n_rows)

    def kernel(x_ref, w1_ref, w2_ref, w3_ref, pvec_ref, stats_ref, o_ref):
        b1 = pvec_ref[0:1, :]
        h = jnp.dot(x_ref[...], w1_ref[...],
                    preferred_element_type=jnp.float32) + b1
        h = _lrelu(h)
        # Normalize with the precomputed GLOBAL batch statistics.
        mean = stats_ref[0:1, :] * inv_n
        var = jnp.maximum(stats_ref[1:2, :] * inv_n - mean * mean, 0.0)
        g2 = pvec_ref[1:2, :]
        bt2 = pvec_ref[2:3, :]
        h = (h - mean) * jax.lax.rsqrt(var + BN_EPS) * g2 + bt2
        _mlp_tail(h, w2_ref, w3_ref, pvec_ref, o_ref, out_n)

    return kernel


# ----------------------------------------------------------------------------
# Wrapper
# ----------------------------------------------------------------------------
def vertexnet_forward(x, params, *, tile_rows=512, fused_row_limit=1024):
    n, f = x.shape
    h_dim = params["w1"].shape[1]
    out_dim = params["w3"].shape[1]
    assert h_dim % 128 == 0, "num_hidden must be a multiple of 128"
    assert out_dim <= h_dim
    out_n = max(8, -(-out_dim // 8) * 8)   # narrow padded output (8 lanes here)
    apply_bn = n > 1

    # bf16 MXU operands (activations + weights); biases/affine stay f32.
    w1 = params["w1"].astype(jnp.bfloat16)
    w2 = params["w2"].astype(jnp.bfloat16)
    w3 = jnp.zeros((h_dim, out_n), jnp.bfloat16).at[:, :out_dim].set(
        params["w3"].astype(jnp.bfloat16))
    b3_row = jnp.zeros((1, h_dim), jnp.float32).at[:, :out_dim].set(params["b3"])
    # Pack the 5 small vectors into one (8, H) array -> a single DMA descriptor.
    # rows: 0=b1, 1=gamma2, 2=beta2, 3=b2, 4=b3 (padded), 5..7 unused.
    pvec = jnp.concatenate(
        [params["b1"], params["g2"], params["bt2"], params["b2"], b3_row,
         jnp.zeros((3, h_dim), jnp.float32)], axis=0)

    if (not apply_bn) or n <= fused_row_limit:
        # ---- Fused whole-batch path: single grid step, no row padding. ----
        x_b = x.astype(jnp.bfloat16)
        y = pl.pallas_call(
            _make_fused_kernel(n, apply_bn, out_n),
            out_shape=jax.ShapeDtypeStruct((n, out_n), jnp.float32),
        )(x_b, w1, w2, w3, pvec)
        return y[:, :out_dim]

    # ---- Tiled path for large N. ----
    tn = tile_rows
    n_pad = -(-n // tn) * tn
    n_tiles = n_pad // tn
    x_b = jnp.pad(x, ((0, n_pad - n), (0, 0))).astype(jnp.bfloat16)

    const2 = lambda t: (0, 0)

    # Pass 1: global BN statistics (reduction -> row axis is serial/arbitrary).
    stats = pl.pallas_call(
        _make_stats_kernel(n, tn),
        out_shape=jax.ShapeDtypeStruct((8, h_dim), jnp.float32),
        grid=(n_tiles,),
        in_specs=[
            pl.BlockSpec((tn, f), lambda t: (t, 0)),     # x row tile
            pl.BlockSpec((f, h_dim), const2),            # w1 (resident)
            pl.BlockSpec((8, h_dim), const2),            # packed biases
        ],
        out_specs=pl.BlockSpec((8, h_dim), const2),      # accumulator block
        compiler_params=pltpu.CompilerParams(
            dimension_semantics=("arbitrary",)),
    )(x_b, w1, pvec)

    # Pass 2: single-phase main kernel; row tiles are independent -> "parallel"
    # (shards across both TensorCores on v7x; no-op on v5e/v6e).
    y = pl.pallas_call(
        _make_main_kernel(n, out_n),
        out_shape=jax.ShapeDtypeStruct((n_pad, out_n), jnp.float32),
        grid=(n_tiles,),
        in_specs=[
            pl.BlockSpec((tn, f), lambda t: (t, 0)),     # x row tile
            pl.BlockSpec((f, h_dim), const2),            # w1 (resident)
            pl.BlockSpec((h_dim, h_dim), const2),        # w2 (resident)
            pl.BlockSpec((h_dim, out_n), const2),        # w3 padded (resident)
            pl.BlockSpec((8, h_dim), const2),            # packed biases/affine
            pl.BlockSpec((8, h_dim), const2),            # global BN stats
        ],
        out_specs=pl.BlockSpec((tn, out_n), lambda t: (t, 0)),
        compiler_params=pltpu.CompilerParams(
            dimension_semantics=("parallel",)),
    )(x_b, w1, w2, w3, pvec, stats)

    return y[:n, :out_dim]


# ----------------------------------------------------------------------------
# Reference + test harness
# ----------------------------------------------------------------------------
def _init_params(key, num_input, num_hidden, num_output):
    """Deterministic PyTorch-style init (uniform +/- 1/sqrt(fan_in))."""
    ks = jax.random.split(key, 8)

    def lin(kw, kb, fan_in, fan_out):
        bound = 1.0 / jnp.sqrt(jnp.float32(fan_in))
        w = jax.random.uniform(kw, (fan_in, fan_out), jnp.float32, -bound, bound)
        b = jax.random.uniform(kb, (1, fan_out), jnp.float32, -bound, bound)
        return w, b

    w1, b1 = lin(ks[0], ks[1], num_input, num_hidden)
    w2, b2 = lin(ks[2], ks[3], num_hidden, num_hidden)
    w3, b3 = lin(ks[4], ks[5], num_hidden, num_output)
    # BatchNorm1d affine params (perturbed from 1/0 defaults to exercise them)
    g2 = 1.0 + 0.1 * jax.random.normal(ks[6], (1, num_hidden), jnp.float32)
    bt2 = 0.1 * jax.random.normal(ks[7], (1, num_hidden), jnp.float32)
    return dict(w1=w1, b1=b1, w2=w2, b2=b2, w3=w3, b3=b3, g2=g2, bt2=bt2)


def _reference_forward(x, p, matmul_dtype=jnp.float32):
    """Pure-JAX reference mirroring the PyTorch forward (optionally bf16 matmuls)."""
    def mm(a, w):
        return jnp.dot(a.astype(matmul_dtype), w.astype(matmul_dtype),
                       preferred_element_type=jnp.float32)

    h = _lrelu(mm(x, p["w1"]) + p["b1"])
    if x.shape[0] > 1:
        m = jnp.mean(h, axis=0, keepdims=True)
        v = jnp.mean((h - m) ** 2, axis=0, keepdims=True)   # biased variance
        h = (h - m) * jax.lax.rsqrt(v + BN_EPS) * p["g2"] + p["bt2"]
    h = _lrelu(mm(h, p["w2"]) + p["b2"])
    y = mm(h, p["w3"]) + p["b3"]
    vtx_pred = y[:, :3]                        # final = Identity
    return jnp.concatenate([vtx_pred, y[:, 3:]], axis=1)


if __name__ == "__main__":
    N, F, H, O = 256, 16, 128, 5   # batch, num_input, num_hidden, num_output
    key = jax.random.PRNGKey(0)
    kx, kxb, kp = jax.random.split(key, 3)
    x = jax.random.normal(kx, (N, F), jnp.float32)
    params = _init_params(kp, F, H, O)

    # --- Fused whole-batch path (BN applied) ---
    out = jax.block_until_ready(vertexnet_forward(x, params))
    assert out.shape == (N, O)
    ref_bf16 = _reference_forward(x, params, matmul_dtype=jnp.bfloat16)
    assert jnp.allclose(out, ref_bf16, atol=1e-3, rtol=1e-3), "mismatch vs bf16 reference"
    ref_f32 = _reference_forward(x, params, matmul_dtype=jnp.float32)
    assert jnp.allclose(out, ref_f32, atol=5e-2, rtol=5e-2), "mismatch vs f32 reference"

    # --- N == 1 path (PyTorch skips both BatchNorms) ---
    x1 = x[:1]
    out1 = jax.block_until_ready(vertexnet_forward(x1, params))
    ref1 = _reference_forward(x1, params, matmul_dtype=jnp.bfloat16)
    assert out1.shape == (1, O)
    assert jnp.allclose(out1, ref1, atol=1e-3, rtol=1e-3), "mismatch (N==1) vs reference"

    # --- Tiled path (stats kernel + parallel main kernel, padded rows) ---
    NB = 1500
    xb = jax.random.normal(kxb, (NB, F), jnp.float32)
    outb = jax.block_until_ready(
        vertexnet_forward(xb, params, tile_rows=512, fused_row_limit=1024))
    refb = _reference_forward(xb, params, matmul_dtype=jnp.bfloat16)
    assert outb.shape == (NB, O)
    assert jnp.allclose(outb, refb, atol=5e-3, rtol=5e-3), "mismatch (tiled) vs reference"
    refb_f32 = _reference_forward(xb, params, matmul_dtype=jnp.float32)
    assert jnp.allclose(outb, refb_f32, atol=5e-2, rtol=5e-2), "mismatch (tiled) vs f32"

    print("KERNEL_OK")
</pallas_src>

<mosaic_0001>
module attributes {stable_mosaic.version = 11 : i64} {
  func.func @kernel(%arg0: memref<256x16xbf16, #tpu.memory_space<vmem>>, %arg1: memref<16x128xbf16, #tpu.memory_space<vmem>>, %arg2: memref<128x128xbf16, #tpu.memory_space<vmem>>, %arg3: memref<128x8xbf16, #tpu.memory_space<vmem>>, %arg4: memref<8x128xf32, #tpu.memory_space<vmem>>, %arg5: memref<256x8xf32, #tpu.memory_space<vmem>>) attributes {dimension_semantics = [], scalar_prefetch = 0 : i64, scratch_operands = 0 : i64, tpu.core_type = #tpu.core_type<tc>} {
    %c0 = arith.constant 0 : index
    %c0_0 = arith.constant 0 : index
    %0 = vector.load %arg4[%c0, %c0_0] : memref<8x128xf32, #tpu.memory_space<vmem>>, vector<1x128xf32>
    %c0_1 = arith.constant 0 : index
    %c0_2 = arith.constant 0 : index
    %1 = vector.load %arg0[%c0_1, %c0_2] : memref<256x16xbf16, #tpu.memory_space<vmem>>, vector<256x16xbf16>
    %c0_3 = arith.constant 0 : index
    %c0_4 = arith.constant 0 : index
    %2 = vector.load %arg1[%c0_3, %c0_4] : memref<16x128xbf16, #tpu.memory_space<vmem>>, vector<16x128xbf16>
    %cst = arith.constant dense<0.000000e+00> : vector<256x128xf32>
    %3 = tpu.matmul %1, %2, %cst {dimension_numbers = #tpu.dot_dimension_numbers<[1], [0], [0], [1], [0, 0, 1, 1], [], []>} : vector<256x16xbf16>, vector<16x128xbf16>, vector<256x128xf32> -> vector<256x128xf32>
    %4 = vector.broadcast %0 : vector<1x128xf32> to vector<256x128xf32>
    %5 = arith.addf %3, %4 : vector<256x128xf32>
    %cst_5 = arith.constant 3.300000e-01 : f32
    %6 = vector.broadcast %cst_5 : f32 to vector<256x128xf32>
    %7 = arith.mulf %6, %5 : vector<256x128xf32>
    %8 = arith.maximumf %5, %7 : vector<256x128xf32>
    %cst_6 = arith.constant dense<0.000000e+00> : vector<128xf32>
    %9 = vector.multi_reduction <add>, %8, %cst_6 [0] : vector<256x128xf32> to vector<128xf32>
    %10 = vector.shape_cast %9 : vector<128xf32> to vector<1x128xf32>
    %cst_7 = arith.constant 3.906250e-03 : f32
    %11 = vector.broadcast %cst_7 : f32 to vector<1x128xf32>
    %12 = arith.mulf %10, %11 : vector<1x128xf32>
    %13 = vector.broadcast %12 : vector<1x128xf32> to vector<256x128xf32>
    %14 = arith.subf %8, %13 : vector<256x128xf32>
    %15 = arith.mulf %14, %14 : vector<256x128xf32>
    %cst_8 = arith.constant dense<0.000000e+00> : vector<128xf32>
    %16 = vector.multi_reduction <add>, %15, %cst_8 [0] : vector<256x128xf32> to vector<128xf32>
    %17 = vector.shape_cast %16 : vector<128xf32> to vector<1x128xf32>
    %cst_9 = arith.constant 3.906250e-03 : f32
    %18 = vector.broadcast %cst_9 : f32 to vector<1x128xf32>
    %19 = arith.mulf %17, %18 : vector<1x128xf32>
    %c1 = arith.constant 1 : index
    %c0_10 = arith.constant 0 : index
    %20 = vector.load %arg4[%c1, %c0_10] : memref<8x128xf32, #tpu.memory_space<vmem>>, vector<1x128xf32>
    %c2 = arith.constant 2 : index
    %c0_11 = arith.constant 0 : index
    %21 = vector.load %arg4[%c2, %c0_11] : memref<8x128xf32, #tpu.memory_space<vmem>>, vector<1x128xf32>
    %cst_12 = arith.constant 9.99999974E-6 : f32
    %22 = vector.broadcast %cst_12 : f32 to vector<1x128xf32>
    %23 = arith.addf %19, %22 : vector<1x128xf32>
    %24 = math.rsqrt %23 : vector<1x128xf32>
    %25 = vector.broadcast %24 : vector<1x128xf32> to vector<256x128xf32>
    %26 = arith.mulf %14, %25 : vector<256x128xf32>
    %27 = vector.broadcast %20 : vector<1x128xf32> to vector<256x128xf32>
    %28 = arith.mulf %26, %27 : vector<256x128xf32>
    %29 = vector.broadcast %21 : vector<1x128xf32> to vector<256x128xf32>
    %30 = arith.addf %28, %29 : vector<256x128xf32>
    %c3 = arith.constant 3 : index
    %c0_13 = arith.constant 0 : index
    %31 = vector.load %arg4[%c3, %c0_13] : memref<8x128xf32, #tpu.memory_space<vmem>>, vector<1x128xf32>
    %c4 = arith.constant 4 : index
    %c0_14 = arith.constant 0 : index
    %32 = vector.load %arg4[%c4, %c0_14] : memref<8x128xf32, #tpu.memory_space<vmem>>, vector<1x8xf32>
    %33 = arith.truncf %30 : vector<256x128xf32> to vector<256x128xbf16>
    %c0_15 = arith.constant 0 : index
    %c0_16 = arith.constant 0 : index
    %34 = vector.load %arg2[%c0_15, %c0_16] : memref<128x128xbf16, #tpu.memory_space<vmem>>, vector<128x128xbf16>
    %cst_17 = arith.constant dense<0.000000e+00> : vector<256x128xf32>
    %35 = tpu.matmul %33, %34, %cst_17 {dimension_numbers = #tpu.dot_dimension_numbers<[1], [0], [0], [1], [0, 0, 1, 1], [], []>} : vector<256x128xbf16>, vector<128x128xbf16>, vector<256x128xf32> -> vector<256x128xf32>
    %36 = vector.broadcast %31 : vector<1x128xf32> to vector<256x128xf32>
    %37 = arith.addf %35, %36 : vector<256x128xf32>
    %cst_18 = arith.constant 3.300000e-01 : f32
    %38 = vector.broadcast %cst_18 : f32 to vector<256x128xf32>
    %39 = arith.mulf %38, %37 : vector<256x128xf32>
    %40 = arith.maximumf %37, %39 : vector<256x128xf32>
    %41 = arith.truncf %40 : vector<256x128xf32> to vector<256x128xbf16>
    %c0_19 = arith.constant 0 : index
    %c0_20 = arith.constant 0 : index
    %42 = vector.load %arg3[%c0_19, %c0_20] : memref<128x8xbf16, #tpu.memory_space<vmem>>, vector<128x8xbf16>
    %cst_21 = arith.constant dense<0.000000e+00> : vector<256x8xf32>
    %43 = tpu.matmul %41, %42, %cst_21 {dimension_numbers = #tpu.dot_dimension_numbers<[1], [0], [0], [1], [0, 0, 1, 1], [], []>} : vector<256x128xbf16>, vector<128x8xbf16>, vector<256x8xf32> -> vector<256x8xf32>
    %44 = vector.broadcast %32 : vector<1x8xf32> to vector<256x8xf32>
    %45 = arith.addf %43, %44 : vector<256x8xf32>
    %c0_22 = arith.constant 0 : index
    %c0_23 = arith.constant 0 : index
    %46 = vector.load %arg5[%c0_22, %c0_23] : memref<256x8xf32, #tpu.memory_space<vmem>>, vector<256x8xf32>
    tpu.vector_store %arg5[%c0_22, %c0_23], %45 {strides = array<i32>} : memref<256x8xf32, #tpu.memory_space<vmem>>, vector<256x8xf32>,
    return
  }
}

</mosaic_0001>

<bundles_post_ra>
// kernel: tpu_custom_call.1
= control target key start
LH: loop header
LB: loop body
LE: loop exit
PB: predicated region body
PF: predicated region fallthrough
CT: control target
= control target key end

     0   :  { %vm146_vm0 = vcmask 130048   ;;  %vm1224_vm1 = vcmask 64512   ;;  %s2335_s1 = inlined_call_operand.vmem [shape: bf16[16,128], index: 1, kind: input, shape index: {}]   ;;  %s2336_s0 = inlined_call_operand.vmem [shape: bf16[256,16], index: 0, kind: input, shape index: {}]   ;;  %s2337_s4 = inlined_call_operand.vmem [shape: f32[8,128], index: 4, kind: input, shape index: {}]   ;;  %s2338_s2 = inlined_call_operand.vmem [shape: bf16[128,128], index: 2, kind: input, shape index: {}]   ;;  %s2339_s3 = inlined_call_operand.vmem [shape: bf16[128,8], index: 3, kind: input, shape index: {}]   ;;  %s2340_s5 = inlined_call_operand.vmem [shape: f32[256,8], index: 5, kind: output, shape index: {}]  }
   0x1   :  { %v1512_v0 = vld [vmem:[%s2335_s1] sm:$0xff]   ;;  %v1514_v2 = vld [vmem:[%s2336_s0 + $0x8] sm:$0xff]   ;;  %v1515_v3 = vld [vmem:[%s2336_s0 + $0x10] sm:$0xff]  }
   0x2   :  { %v1513_v1 = vld [vmem:[%s2336_s0] sm:$0xff]   ;;  %1380 = vmatprep.subr.bf16.mxu0 %v1512_v0  ;;  %1510 = vmatprep.subr.bf16.mxu1 %v1512_v0  ;;  %v1516_v4 = vld [vmem:[%s2336_s0 + $0x18] sm:$0xff]   ;;  %v1522_v7 = vld [vmem:[%s2336_s0 + $0x48] sm:$0xff]  }
   0x3   :  { %1381 = vmatpush3.bf16.msra.mxu0 %v1512_v0  ;;  %1382 = vmatprep.mubr.msk.bf16.mxu0 %vm146_vm0, %v1513_v1  ;;  %v1517_v5 = vld [vmem:[%s2336_s0 + $0x20] sm:$0xff]   ;;  %v1523_v8 = vld [vmem:[%s2336_s0 + $0x50] sm:$0xff]   ;;  %v1524_v9 = vld [vmem:[%s2336_s0 + $0x58] sm:$0xff]  }
   0x4   :  { %1511 = vmatpush3.bf16.msra.mxu1 %v1512_v0  ;;  %v1521_v6 = vld [vmem:[%s2336_s0 + $0x40] sm:$0xff]   ;;  %v1518_v11 = vld [vmem:[%s2336_s0 + $0x28] sm:$0xff]   ;;  %v1519_v12 = vld [vmem:[%s2336_s0 + $0x30] sm:$0xff]  }
   0x5   :  { %1398 = vmatprep.mubr.msk.bf16.mxu1 %vm146_vm0, %v1521_v6  ;;  %v1525_v10 = vld [vmem:[%s2336_s0 + $0x60] sm:$0xff]   ;;  %v1526_v13 = vld [vmem:[%s2336_s0 + $0x68] sm:$0xff]   ;;  %v1527_v14 = vld [vmem:[%s2336_s0 + $0x70] sm:$0xff]  }
   0x6   :  { %1383 = vmatmul.mubr.msk.bf16.vlgmr.msra.gmra.mrb[0].mxu0 %vm146_vm0, %v1514_v2  ;;  %v1520_v15 = vld [vmem:[%s2336_s0 + $0x38] sm:$0xff]   ;;  %v1647_v17 = vld [vmem:[%s2337_s4] ss:$0 sm:$0xff] }
   0x7   :  { %1386 = vmatprep.mubr.msk.bf16.mxu0 %vm146_vm0, %v1515_v3  ;;  %1399 = vmatmul.mubr.msk.bf16.vlgmr.msra.gmra.mrb[0].mxu1 %vm146_vm0, %v1522_v7  ;;  %v1528_v16 = vld [vmem:[%s2336_s0 + $0x78] sm:$0xff]  }
   0x8   :  { %1402 = vmatprep.mubr.msk.bf16.mxu1 %vm146_vm0, %v1523_v8 }
   0xe   :  { %1387 = vmatmul.mubr.msk.bf16.gmra.mrb[4].mxu0 %vm146_vm0, %v1516_v4 }
   0xf   :  { %1390 = vmatprep.mubr.msk.bf16.mxu0 %vm146_vm0, %v1517_v5  ;;  %1403 = vmatmul.mubr.msk.bf16.gmra.mrb[4].mxu1 %vm146_vm0, %v1524_v9 }
  0x10   :  { %1406 = vmatprep.mubr.msk.bf16.mxu1 %vm146_vm0, %v1525_v10 }
  0x16   :  { %1391 = vmatmul.mubr.msk.bf16.gmra.mrb[8].mxu0 %vm146_vm0, %v1518_v11 }
  0x17   :  { %1394 = vmatprep.mubr.msk.bf16.mxu0 %vm146_vm0, %v1519_v12  ;;  %1407 = vmatmul.mubr.msk.bf16.gmra.mrb[8].mxu1 %vm146_vm0, %v1526_v13 }
  0x18   :  { %1410 = vmatprep.mubr.msk.bf16.mxu1 %vm146_vm0, %v1527_v14 }
  0x1e   :  { %1395 = vmatmul.mubr.msk.bf16.gmra.mrb[12].mxu0 %vm146_vm0, %v1520_v15 }
  0x1f   :  { %1411 = vmatmul.mubr.msk.bf16.gmra.mrb[12].mxu1 %vm146_vm0, %v1528_v16 }
  0xd9   :  { %v1384_v18 = vpop.f32.mrb[0].mxu0 }
  0xda   :  { %v229_v19 = vpop.f32.mrb[1].mxu0  ;;  %v238_v20 = vadd.f32 %v1384_v18, %v1647_v17  ;;  %v1653_v29 = vpop.f32.mrb[0].mxu1 }
  0xdb   :  { %v230_v21 = vadd.f32 %v1647_v17, %v229_v19  ;;  %v1385_v22 = vpop.f32.mrb[2].mxu0  ;;  %v1655_v31 = vpop.f32.mrb[1].mxu1 }
  0xdc   :  { %v241_v23 = vadd.f32 %v1385_v22, %v1647_v17  ;;  %v232_v24 = vpop.f32.mrb[3].mxu0  ;;  %v358_v27 = vmul.f32 0.33, %v238_v20  ;;  %v1661_v35 = vpop.f32.mrb[2].mxu1 }
  0xdd   :  { %v356_v25 = vmul.f32 0.33, %v230_v21  ;;  %v233_v26 = vadd.f32 %v1647_v17, %v232_v24  ;;  %v1663_v37 = vpop.f32.mrb[3].mxu1 }
  0xde   :  { %v359_v30 = vmul.f32 0.33, %v241_v23  ;;  %v1665_v38 = vmax.f32 %v238_v20, %v358_v27 }
  0xdf   :  { %v357_v28 = vmul.f32 0.33, %v233_v26  ;;  %v1657_v32 = vmax.f32 %v230_v21, %v356_v25 }
  0xe0   :  { %v1671_v43 = vmax.f32 %v241_v23, %v359_v30 }
  0xe1   :  { %v1659_v33 = vmax.f32 %v233_v26, %v357_v28  ;;  %v1388_v34 = vpop.f32.mrb[4].mxu0 }
  0xe2   :  { %v245_v36 = vpop.f32.mrb[5].mxu0  ;;  %v254_v40 = vadd.f32 %v1388_v34, %v1647_v17  ;;  %v1679_v53 = vpop.f32.mrb[4].mxu1 }
  0xe3   :  { %v420_v39 = vadd.f32 %v1659_v33, %v1657_v32  ;;  %v246_v41 = vadd.f32 %v1647_v17, %v245_v36  ;;  %v1389_v42 = vpop.f32.mrb[6].mxu0  ;;  %v1681_v54 = vpop.f32.mrb[5].mxu1 }
  0xe4   :  { %v248_v44 = vpop.f32.mrb[7].mxu0  ;;  %v257_v47 = vadd.f32 %v1389_v42, %v1647_v17  ;;  %v362_v49 = vmul.f32 0.33, %v254_v40  ;;  %v1686_v59 = vpop.f32.mrb[6].mxu1 }
  0xe5   :  { %v421_v45 = vadd.f32 %v420_v39, %v1665_v38  ;;  %v360_v46 = vmul.f32 0.33, %v246_v41  ;;  %v249_v48 = vadd.f32 %v1647_v17, %v248_v44  ;;  %v1688_v61 = vpop.f32.mrb[7].mxu1 }
  0xe6   :  { %v363_v56 = vmul.f32 0.33, %v257_v47  ;;  %v1690_v62 = vmax.f32 %v254_v40, %v362_v49 }
  0xe7   :  { %v1676_v50 = vmax.f32 %v246_v41, %v360_v46  ;;  %v422_v51 = vadd.f32 %v421_v45, %v1671_v43  ;;  %v361_v52 = vmul.f32 0.33, %v249_v48  ;;  %v294_v41 = vadd.f32 %v1647_v17, %v1655_v31 }
  0xe8   :  { %v1696_v5 = vmax.f32 %v257_v47, %v363_v56 }
  0xe9   :  { %v423_v55 = vadd.f32 %v422_v51, %v1676_v50  ;;  %v1684_v57 = vmax.f32 %v249_v48, %v361_v52  ;;  %v1392_v58 = vpop.f32.mrb[8].mxu0  ;;  %v297_v48 = vadd.f32 %v1647_v17, %v1663_v37  ;;  %v305_v37 = vadd.f32 %v1661_v35, %v1647_v17 }
  0xea   :  { %v261_v60 = vpop.f32.mrb[9].mxu0  ;;  %v270_v0 = vadd.f32 %v1392_v58, %v1647_v17  ;;  %v1703_v13 = vpop.f32.mrb[8].mxu1 }
  0xeb   :  { %v424_v63 = vadd.f32 %v423_v55, %v1684_v57  ;;  %v262_v1 = vadd.f32 %v1647_v17, %v261_v60  ;;  %v1393_v2 = vpop.f32.mrb[10].mxu0  ;;  %v325_v15 = vpop.f32.mrb[9].mxu1 }
  0xec   :  { %v273_v3 = vadd.f32 %v1393_v2, %v1647_v17  ;;  %v264_v4 = vpop.f32.mrb[11].mxu0  ;;  %v366_v9 = vmul.f32 0.33, %v270_v0  ;;  %v1708_v20 = vpop.f32.mrb[10].mxu1 }
  0xed   :  { %v425_v6 = vadd.f32 %v424_v63, %v1690_v62  ;;  %v364_v7 = vmul.f32 0.33, %v262_v1  ;;  %v265_v8 = vadd.f32 %v1647_v17, %v264_v4  ;;  %v328_v22 = vpop.f32.mrb[11].mxu1  ;;  %v302_v63 = vadd.f32 %v1653_v29, %v1647_v17 }
  0xee   :  { %v367_v14 = vmul.f32 0.33, %v273_v3  ;;  %v1710_v23 = vmax.f32 %v270_v0, %v366_v9  ;;  %v372_v0 = vmul.f32 0.33, %v294_v41  ;;  %v375_v9 = vmul.f32 0.33, %v305_v37 }
  0xef   :  { %v1700_v10 = vmax.f32 %v262_v1, %v364_v7  ;;  %v426_v11 = vadd.f32 %v425_v6, %v1696_v5  ;;  %v365_v12 = vmul.f32 0.33, %v265_v8  ;;  %v373_v1 = vmul.f32 0.33, %v297_v48 }
  0xf0   :  { %v1715_v28 = vmax.f32 %v273_v3, %v367_v14  ;;  %v374_v4 = vmul.f32 0.33, %v302_v63  ;;  %v1744_v6 = vmax.f32 %v294_v41, %v372_v0  ;;  %v318_v29 = vadd.f32 %v1679_v53, %v1647_v17 }
  0xf1   :  { %v427_v16 = vadd.f32 %v426_v11, %v1700_v10  ;;  %v1706_v18 = vmax.f32 %v265_v8, %v365_v12  ;;  %v1396_v19 = vpop.f32.mrb[12].mxu0  ;;  %v310_v8 = vadd.f32 %v1647_v17, %v1681_v54  ;;  %v1749_v11 = vmax.f32 %v297_v48, %v373_v1 }
  0xf2   :  { %v277_v21 = vpop.f32.mrb[13].mxu0  ;;  %v286_v25 = vadd.f32 %v1396_v19, %v1647_v17  ;;  %v1725_v47 = vpop.f32.mrb[12].mxu1  ;;  %v321_v12 = vadd.f32 %v1686_v59, %v1647_v17  ;;  %v313_v14 = vadd.f32 %v1647_v17, %v1688_v61  ;;  %v1759_v19 = vmax.f32 %v302_v63, %v374_v4  ;;  %v1529_v59 = vld [vmem:[%s2338_s2] sm:$0xff]   ;;  %v1532_v4 = vld [vmem:[%s2338_s2 + $0x18] sm:$0xff]  }
  0xf3   :  { %v428_v24 = vadd.f32 %v427_v16, %v1706_v18  ;;  %v278_v26 = vadd.f32 %v1647_v17, %v277_v21  ;;  %v1397_v27 = vpop.f32.mrb[14].mxu0  ;;  %v341_v49 = vpop.f32.mrb[13].mxu1  ;;  %v326_v16 = vadd.f32 %v1647_v17, %v325_v15  ;;  %v376_v21 = vmul.f32 0.33, %v310_v8  ;;  %1414 = vmatprep.subr.bf16.mxu1 %v1529_v59 }
  0xf4   :  { %v280_v30 = vpop.f32.mrb[15].mxu0  ;;  %v289_v39 = vadd.f32 %v1397_v27, %v1647_v17  ;;  %v370_v42 = vmul.f32 0.33, %v286_v25  ;;  %v1732_v56 = vpop.f32.mrb[14].mxu1  ;;  %v377_v27 = vmul.f32 0.33, %v313_v14  ;;  %1415 = vmatpush3.bf16.msra.mxu1 %v1529_v59 }
  0xf5   :  { %v429_v34 = vadd.f32 %v428_v24, %v1710_v23  ;;  %v368_v36 = vmul.f32 0.33, %v278_v26  ;;  %v281_v40 = vadd.f32 %v1647_v17, %v280_v30  ;;  %v344_v31 = vpop.f32.mrb[15].mxu1  ;;  %v1762_v24 = vmax.f32 %v305_v37, %v375_v9  ;;  %v1535_v59 = vld [vmem:[%s2338_s2 + $0x30] sm:$0xff]  }
  0xf6   :  { %v371_v52 = vmul.f32 0.33, %v289_v39  ;;  %v1734_v58 = vmax.f32 %v286_v25, %v370_v42  ;;  %v378_v25 = vmul.f32 0.33, %v318_v29  ;;  %v380_v30 = vmul.f32 0.33, %v326_v16 }
  0xf7   :  { %v1722_v44 = vmax.f32 %v278_v26, %v368_v36  ;;  %v430_v45 = vadd.f32 %v429_v34, %v1715_v28  ;;  %v369_v46 = vmul.f32 0.33, %v281_v40  ;;  %v379_v26 = vmul.f32 0.33, %v321_v12 }
  0xf8   :  { %v1741_v2 = vmax.f32 %v289_v39, %v371_v52  ;;  %v1768_v61 = vmax.f32 %v310_v8, %v376_v21  ;;  %v1772_v36 = vmax.f32 %v313_v14, %v377_v27  ;;  %v329_v39 = vadd.f32 %v1647_v17, %v328_v22  ;;  %v1531_v52 = vld [vmem:[%s2338_s2 + $0x10] sm:$0xff]  }
  0xf9   :  { %v431_v51 = vadd.f32 %v430_v45, %v1722_v44  ;;  %v1730_v55 = vmax.f32 %v281_v40, %v369_v46  ;;  %v1530_v40 = vld [vmem:[%s2338_s2 + $0x8] sm:$0xff]   ;;  %v1778_v41 = vmax.f32 %v318_v29, %v378_v25  ;;  %v334_v45 = vadd.f32 %v1703_v13, %v1647_v17 }
  0xfa   :  { %1416 = vmatprep.subr.bf16.mxu1 %v1530_v40  ;;  %v1783_v46 = vmax.f32 %v321_v12, %v379_v26  ;;  %v337_v22 = vadd.f32 %v1708_v20, %v1647_v17  ;;  %v1791_v63 = vmax.f32 %v326_v16, %v380_v30  ;;  %v342_v13 = vadd.f32 %v1647_v17, %v341_v49  ;;  %v1534_v26 = vld [vmem:[%s2338_s2 + $0x28] sm:$0xff]  }
  0xfb   :  { %v432_v60 = vadd.f32 %v431_v51, %v1730_v55  ;;  %v381_v51 = vmul.f32 0.33, %v329_v39  ;;  %1417 = vmatpush3.bf16.msra.mxu1 %v1530_v40  ;;  %v345_v20 = vadd.f32 %v1647_v17, %v344_v31  ;;  %v350_v9 = vadd.f32 %v1725_v47, %v1647_v17  ;;  %v1533_v31 = vld [vmem:[%s2338_s2 + $0x20] sm:$0xff]  }
  0xfc   :  { %1418 = vmatprep.subr.bf16.mxu1 %v1531_v52  ;;  %v383_v1 = vmul.f32 0.33, %v337_v22  ;;  %v384_v29 = vmul.f32 0.33, %v342_v13  ;;  %v353_v12 = vadd.f32 %v1732_v56, %v1647_v17 }
  0xfd   :  { %v433_v3 = vadd.f32 %v432_v60, %v1734_v58  ;;  %v382_v60 = vmul.f32 0.33, %v334_v45  ;;  %v385_v14 = vmul.f32 0.33, %v345_v20  ;;  %v386_v16 = vmul.f32 0.33, %v350_v9 }
  0xfe   :  { %v415_v49 = vmax.f32 %v337_v22, %v383_v1 }
  0xff   :  { %v434_v7 = vadd.f32 %v433_v3, %v1741_v2  ;;  %v413_v3 = vmax.f32 %v329_v39, %v381_v51  ;;  %1419 = vmatpush3.bf16.msra.mxu1 %v1531_v52  ;;  %v417_v47 = vmax.f32 %v345_v20, %v385_v14  ;;  %v418_v27 = vmax.f32 %v350_v9, %v386_v16  ;;  %v1536_v39 = vld [vmem:[%s2338_s2 + $0x38] sm:$0xff]  }
 0x100   :  { %1420 = vmatprep.subr.bf16.mxu1 %v1532_v4 }
 0x101   :  { %v435_v35 = vadd.f32 %v434_v7, %v1744_v6  ;;  %v414_v7 = vmax.f32 %v334_v45, %v382_v60 }
 0x103   :  { %v436_v54 = vadd.f32 %v435_v35, %v1749_v11  ;;  %1421 = vmatpush3.bf16.msra.mxu1 %v1532_v4 }
 0x104   :  { %1422 = vmatprep.subr.bf16.mxu1 %v1533_v31 }
 0x105   :  { %v437_v53 = vadd.f32 %v436_v54, %v1759_v19  ;;  %v416_v54 = vmax.f32 %v342_v13, %v384_v29 }
 0x107   :  { %v438_v15 = vadd.f32 %v437_v53, %v1762_v24  ;;  %v387_v53 = vmul.f32 0.33, %v353_v12  ;;  %1423 = vmatpush3.bf16.msra.mxu1 %v1533_v31 }
 0x108   :  { %1424 = vmatprep.subr.bf16.mxu1 %v1534_v26 }
 0x109   :  { %v439_v34 = vadd.f32 %v438_v15, %v1768_v61  ;;  %v419_v56 = vmax.f32 %v353_v12, %v387_v53 }
 0x10b   :  { %v440_v42 = vadd.f32 %v439_v34, %v1772_v36  ;;  %1425 = vmatpush3.bf16.msra.mxu1 %v1534_v26 }
 0x10c   :  { %1426 = vmatprep.subr.bf16.mxu1 %v1535_v59 }
 0x10d   :  { %v441_v48 = vadd.f32 %v440_v42, %v1778_v41 }
 0x10f   :  { %v442_v0 = vadd.f32 %v441_v48, %v1783_v46  ;;  %1427 = vmatpush3.bf16.msra.mxu1 %v1535_v59 }
 0x110   :  { %1428 = vmatprep.subr.bf16.mxu1 %v1536_v39 }
 0x111   :  { %v443_v37 = vadd.f32 %v442_v0, %v1791_v63 }
 0x113   :  { %v444_v8 = vadd.f32 %v443_v37, %v413_v3  ;;  %1429 = vmatpush3.bf16.msra.mxu1 %v1536_v39 }
 0x115   :  { %v445_v35 = vadd.f32 %v444_v8, %v414_v7 }
 0x117   :  { %v446_v21 = vadd.f32 %v445_v35, %v415_v49 }
 0x119   :  { %v447_v25 = vadd.f32 %v446_v21, %v416_v54 }
 0x11b   :  { %v448_v17 = vadd.f32 %v447_v25, %v417_v47 }
 0x11d   :  { %v449_v30 = vadd.f32 %v448_v17, %v418_v27 }
 0x11f   :  { %v450_v15 = vadd.f32 %v449_v30, %v419_v56 }
 0x121   :  { %v451_v34 = vrot.slane %v450_v15, 4 }
 0x123   :  { %v452_v40 = vadd.f32 %v451_v34, %v450_v15 }
 0x125   :  { %v453_v42 = vrot.slane %v452_v40, 2 }
 0x127   :  { %v454_v45 = vadd.f32 %v453_v42, %v452_v40 }
 0x129   :  { %v455_v48 = vrot.slane %v454_v45, 1 }
 0x12b   :  { %v456_v22 = vadd.f32 %v455_v48, %v454_v45 }
 0x12d   :  { %v457_v51 = vmul.f32 0.00390625, %v456_v22 }
 0x12f   :  { %v1817_v52 = vsub.f32 %v1700_v10, %v457_v51  ;;  %v1820_v60 = vsub.f32 %v1706_v18, %v457_v51  ;;  %v1823_v0 = vsub.f32 %v1710_v23, %v457_v51  ;;  %v1826_v13 = vsub.f32 %v1715_v28, %v457_v51 }
 0x130   :  { %v1829_v37 = vsub.f32 %v1722_v44, %v457_v51  ;;  %v1832_v1 = vsub.f32 %v1730_v55, %v457_v51  ;;  %v1835_v20 = vsub.f32 %v1734_v58, %v457_v51  ;;  %v1838_v10 = vsub.f32 %v1741_v2, %v457_v51 }
 0x131   :  { %v1841_v18 = vsub.f32 %v1744_v6, %v457_v51  ;;  %v1844_v23 = vsub.f32 %v1749_v11, %v457_v51  ;;  %v1847_v28 = vsub.f32 %v1759_v19, %v457_v51  ;;  %v1850_v44 = vsub.f32 %v1762_v24, %v457_v51 }
 0x132   :  { %v1853_v55 = vsub.f32 %v1768_v61, %v457_v51  ;;  %v1856_v58 = vsub.f32 %v1772_v36, %v457_v51  ;;  %v1859_v2 = vsub.f32 %v1778_v41, %v457_v51  ;;  %v1862_v6 = vsub.f32 %v1783_v46, %v457_v51 }
 0x133   :  { %v1865_v11 = vsub.f32 %v1791_v63, %v457_v51  ;;  %v1867_v19 = vsub.f32 %v413_v3, %v457_v51  ;;  %v1869_v4 = vsub.f32 %v414_v7, %v457_v51  ;;  %v1871_v24 = vsub.f32 %v415_v49, %v457_v51 }
 0x134   :  { %v1873_v61 = vsub.f32 %v416_v54, %v457_v51  ;;  %v1875_v8 = vsub.f32 %v417_v47, %v457_v51  ;;  %v1877_v36 = vsub.f32 %v418_v27, %v457_v51  ;;  %v1879_v41 = vsub.f32 %v419_v56, %v457_v51 }
 0x135   :  { %v1882_v46 = vsub.f32 %v1657_v32, %v457_v51  ;;  %v1885_v63 = vsub.f32 %v1659_v33, %v457_v51  ;;  %v1888_v3 = vsub.f32 %v1665_v38, %v457_v51  ;;  %v1895_v29 = vsub.f32 %v1671_v43, %v457_v51 }
 0x136   :  { %v1898_v49 = vsub.f32 %v1676_v50, %v457_v51  ;;  %v1903_v35 = vsub.f32 %v1684_v57, %v457_v51  ;;  %v1908_v14 = vsub.f32 %v1690_v62, %v457_v51  ;;  %v1913_v50 = vsub.f32 %v1696_v5, %v457_v51 }
 0x137   :  { %v490_v7 = vmul.f32 %v1882_v46, %v1882_v46  ;;  %v491_v9 = vmul.f32 %v1885_v63, %v1885_v63  ;;  %v492_v32 = vmul.f32 %v1888_v3, %v1888_v3  ;;  %v493_v38 = vmul.f32 %v1895_v29, %v1895_v29 }
 0x138   :  { %v494_v43 = vmul.f32 %v1898_v49, %v1898_v49  ;;  %v495_v16 = vmul.f32 %v1903_v35, %v1903_v35  ;;  %v496_v57 = vmul.f32 %v1908_v14, %v1908_v14  ;;  %v497_v25 = vmul.f32 %v1913_v50, %v1913_v50 }
 0x139   :  { %v522_v33 = vadd.f32 %v491_v9, %v490_v7  ;;  %v498_v53 = vmul.f32 %v1817_v52, %v1817_v52  ;;  %v499_v5 = vmul.f32 %v1820_v60, %v1820_v60  ;;  %v500_v27 = vmul.f32 %v1823_v0, %v1823_v0 }
 0x13a   :  { %v501_v56 = vmul.f32 %v1826_v13, %v1826_v13  ;;  %v502_v59 = vmul.f32 %v1829_v37, %v1829_v37  ;;  %v503_v34 = vmul.f32 %v1832_v1, %v1832_v1  ;;  %v504_v40 = vmul.f32 %v1835_v20, %v1835_v20 }
 0x13b   :  { %v523_v12 = vadd.f32 %v522_v33, %v492_v32  ;;  %v505_v45 = vmul.f32 %v1838_v10, %v1838_v10  ;;  %v506_v22 = vmul.f32 %v1841_v18, %v1841_v18  ;;  %v507_v7 = vmul.f32 %v1844_v23, %v1844_v23 }
 0x13c   :  { %v508_v32 = vmul.f32 %v1847_v28, %v1847_v28 }
 0x13d   :  { %v524_v31 = vadd.f32 %v523_v12, %v493_v38  ;;  %v1537_v38 = vld [vmem:[%s2339_s3] sm:$0xff]   ;;  %v509_v12 = vmul.f32 %v1850_v44, %v1850_v44 }
 0x13e   :  { %1462 = vmatprep.subr.bf16.mxu0 %v1537_v38 }
 0x13f   :  { %v525_v54 = vadd.f32 %v524_v31, %v494_v43  ;;  %v1538_v31 = vld [vmem:[%s2339_s3 + $0x8] sm:$0xff]   ;;  %1463 = vmatpush3.bf16.msra.mxu0 %v1537_v38 }
 0x140   :  { %1464 = vmatprep.subr.bf16.mxu0 %v1538_v31 }
 0x141   :  { %v526_v21 = vadd.f32 %v525_v54, %v495_v16  ;;  %v510_v16 = vmul.f32 %v1853_v55, %v1853_v55 }
 0x143   :  { %v527_v62 = vadd.f32 %v526_v21, %v496_v57  ;;  %v1539_v57 = vld [vmem:[%s2339_s3 + $0x10] sm:$0xff]   ;;  %v511_v21 = vmul.f32 %v1856_v58, %v1856_v58  ;;  %1465 = vmatpush3.bf16.msra.mxu0 %v1538_v31 }
 0x144   :  { %1466 = vmatprep.subr.bf16.mxu0 %v1539_v57 }
 0x145   :  { %v528_v47 = vadd.f32 %v527_v62, %v497_v25  ;;  %v512_v62 = vmul.f32 %v1859_v2, %v1859_v2 }
 0x147   :  { %v529_v26 = vadd.f32 %v528_v47, %v498_v53  ;;  %v1540_v47 = vld [vmem:[%s2339_s3 + $0x18] sm:$0xff]   ;;  %1467 = vmatpush3.bf16.msra.mxu0 %v1539_v57 }
 0x148   :  { %1468 = vmatprep.subr.bf16.mxu0 %v1540_v47 }
 0x149   :  { %v530_v17 = vadd.f32 %v529_v26, %v499_v5  ;;  %v513_v5 = vmul.f32 %v1862_v6, %v1862_v6 }
 0x14b   :  { %v531_v30 = vadd.f32 %v530_v17, %v500_v27  ;;  %v514_v27 = vmul.f32 %v1865_v11, %v1865_v11  ;;  %1469 = vmatpush3.bf16.msra.mxu0 %v1540_v47 }
 0x14d   :  { %v532_v15 = vadd.f32 %v531_v30, %v501_v56  ;;  %v1541_v56 = vld [vmem:[%s2339_s3 + $0x20] sm:$0xff]   ;;  %v515_v30 = vmul.f32 %v1867_v19, %v1867_v19 }
 0x14e   :  { %1470 = vmatprep.subr.bf16.mxu0 %v1541_v56 }
 0x14f   :  { %v533_v39 = vadd.f32 %v532_v15, %v502_v59  ;;  %v516_v15 = vmul.f32 %v1869_v4, %v1869_v4  ;;  %1471 = vmatpush3.bf16.msra.mxu0 %v1541_v56 }
 0x151   :  { %v534_v42 = vadd.f32 %v533_v39, %v503_v34  ;;  %v517_v39 = vmul.f32 %v1871_v24, %v1871_v24 }
 0x153   :  { %v535_v48 = vadd.f32 %v534_v42, %v504_v40  ;;  %v518_v42 = vmul.f32 %v1873_v61, %v1873_v61 }
 0x155   :  { %v536_v51 = vadd.f32 %v535_v48, %v505_v45  ;;  %v519_v48 = vmul.f32 %v1875_v8, %v1875_v8 }
 0x157   :  { %v537_v9 = vadd.f32 %v536_v51, %v506_v22  ;;  %v520_v51 = vmul.f32 %v1877_v36, %v1877_v36 }
 0x159   :  { %v538_v33 = vadd.f32 %v537_v9, %v507_v7  ;;  %v521_v9 = vmul.f32 %v1879_v41, %v1879_v41 }
 0x15b   :  { %v539_v43 = vadd.f32 %v538_v33, %v508_v32 }
 0x15d   :  { %v540_v54 = vadd.f32 %v539_v43, %v509_v12 }
 0x15f   :  { %v541_v25 = vadd.f32 %v540_v54, %v510_v16 }
 0x161   :  { %v542_v53 = vadd.f32 %v541_v25, %v511_v21 }
 0x163   :  { %v543_v26 = vadd.f32 %v542_v53, %v512_v62 }
 0x165   :  { %v544_v17 = vadd.f32 %v543_v26, %v513_v5  ;;  %v1997_v26 = vld [vmem:[%s2337_s4 + $0x1] ss:$0 sm:$0xff] }
 0x167   :  { %v545_v59 = vadd.f32 %v544_v17, %v514_v27 }
 0x169   :  { %v546_v34 = vadd.f32 %v545_v59, %v515_v30 }
 0x16b   :  { %v547_v40 = vadd.f32 %v546_v34, %v516_v15 }
 0x16d   :  { %v548_v45 = vadd.f32 %v547_v40, %v517_v39 }
 0x16f   :  { %v549_v22 = vadd.f32 %v548_v45, %v518_v42 }
 0x171   :  { %v550_v7 = vadd.f32 %v549_v22, %v519_v48 }
 0x173   :  { %v551_v32 = vadd.f32 %v550_v7, %v520_v51 }
 0x175   :  { %v552_v33 = vadd.f32 %v551_v32, %v521_v9 }
 0x177   :  { %v553_v38 = vrot.slane %v552_v33, 4 }
 0x179   :  { %v554_v12 = vadd.f32 %v553_v38, %v552_v33 }
 0x17b   :  { %v555_v43 = vrot.slane %v554_v12, 2 }
 0x17d   :  { %v556_v31 = vadd.f32 %v555_v43, %v554_v12 }
 0x17f   :  { %v557_v16 = vrot.slane %v556_v31, 1 }
 0x181   :  { %v558_v54 = vadd.f32 %v557_v16, %v556_v31 }
 0x183   :  { %v559_v57 = vmul.f32 0.00390625, %v558_v54 }
 0x185   :  { %v562_v21 = vadd.f32 1e-05, %v559_v57 }
 0x187   :  { %1545 = vrsqrt.f32 %v562_v21 }
 0x191   :  { %v1984_v25 = vpop.eup %1545 }
 0x192   :  { %v564_v62 = vmul.f32 %v1984_v25, %v1882_v46  ;;  %v565_v53 = vmul.f32 %v1984_v25, %v1885_v63  ;;  %v566_v47 = vmul.f32 %v1984_v25, %v1888_v3  ;;  %v567_v5 = vmul.f32 %v1984_v25, %v1895_v29  ;;  %v2006_v63 = vld [vmem:[%s2337_s4 + $0x2] ss:$0 sm:$0xff] }
 0x193   :  { %v568_v27 = vmul.f32 %v1984_v25, %v1898_v49  ;;  %v569_v46 = vmul.f32 %v1984_v25, %v1903_v35  ;;  %v570_v3 = vmul.f32 %v1984_v25, %v1908_v14  ;;  %v571_v29 = vmul.f32 %v1984_v25, %v1913_v50 }
 0x194   :  { %v602_v17 = vmul.f32 %v1997_v26, %v566_v47  ;;  %v603_v56 = vmul.f32 %v1997_v26, %v567_v5  ;;  %v600_v49 = vmul.f32 %v1997_v26, %v564_v62  ;;  %v601_v30 = vmul.f32 %v1997_v26, %v565_v53 }
 0x195   :  { %v572_v35 = vmul.f32 %v1984_v25, %v1817_v52  ;;  %v573_v59 = vmul.f32 %v1984_v25, %v1820_v60  ;;  %v604_v15 = vmul.f32 %v1997_v26, %v568_v27  ;;  %v605_v14 = vmul.f32 %v1997_v26, %v569_v46 }
 0x196   :  { %v638_v50 = vadd.f32 %v2006_v63, %v602_v17  ;;  %v639_v34 = vadd.f32 %v2006_v63, %v603_v56  ;;  %v636_v39 = vadd.f32 %v2006_v63, %v600_v49  ;;  %v637_v40 = vadd.f32 %v2006_v63, %v601_v30 }
 0x197   :  { %v640_v42 = vadd.f32 %v2006_v63, %v604_v15  ;;  %v641_v45 = vadd.f32 %v2006_v63, %v605_v14  ;;  %v606_v60 = vmul.f32 %v1997_v26, %v570_v3  ;;  %v607_v22 = vmul.f32 %v1997_v26, %v571_v29 }
 0x198   :  { %v670_v52 = vpack.c.bf16 %v637_v40, %v636_v39  ;;  %v671_v48 = vpack.c.bf16 %v639_v34, %v638_v50  ;;  %v608_v7 = vmul.f32 %v1997_v26, %v572_v35  ;;  %v609_v9 = vmul.f32 %v1997_v26, %v573_v59 }
 0x199   :  { %v672_v51 = vpack.c.bf16 %v641_v45, %v640_v42  ;;  %v574_v32 = vmul.f32 %v1984_v25, %v1823_v0  ;;  %v575_v33 = vmul.f32 %v1984_v25, %v1826_v13  ;;  %v642_v38 = vadd.f32 %v2006_v63, %v606_v60 }
 0x19a   :  { %1430 = vmatprep.mubr.bf16.mxu1 %v670_v52  ;;  %v643_v12 = vadd.f32 %v2006_v63, %v607_v22  ;;  %v576_v43 = vmul.f32 %v1984_v25, %v1829_v37  ;;  %v577_v31 = vmul.f32 %v1984_v25, %v1832_v1  ;;  %v644_v16 = vadd.f32 %v2006_v63, %v608_v7 }
 0x19b   :  { %1431 = vmatmul.mubr.bf16.vlgmr.msra.gmra.mrb[16].mxu1 %v671_v48  ;;  %v645_v54 = vadd.f32 %v2006_v63, %v609_v9  ;;  %v610_v0 = vmul.f32 %v1997_v26, %v574_v32  ;;  %v611_v21 = vmul.f32 %v1997_v26, %v575_v33  ;;  %v578_v37 = vmul.f32 %v1984_v25, %v1835_v20 }
 0x19c   :  { %1434 = vmatprep.mubr.bf16.mxu1 %v672_v51  ;;  %v673_v57 = vpack.c.bf16 %v643_v12, %v642_v38  ;;  %v612_v62 = vmul.f32 %v1997_v26, %v576_v43  ;;  %v613_v53 = vmul.f32 %v1997_v26, %v577_v31  ;;  %v579_v1 = vmul.f32 %v1984_v25, %v1838_v10 }
 0x19d   :  { %v674_v13 = vpack.c.bf16 %v645_v54, %v644_v16  ;;  %v646_v47 = vadd.f32 %v2006_v63, %v610_v0  ;;  %v647_v5 = vadd.f32 %v2006_v63, %v611_v21  ;;  %v580_v27 = vmul.f32 %v1984_v25, %v1841_v18 }
 0x19e   :  { %v581_v46 = vmul.f32 %v1984_v25, %v1844_v23  ;;  %v648_v3 = vadd.f32 %v2006_v63, %v612_v62  ;;  %v649_v29 = vadd.f32 %v2006_v63, %v613_v53  ;;  %v614_v20 = vmul.f32 %v1997_v26, %v578_v37 }
 0x19f   :  { %v675_v17 = vpack.c.bf16 %v647_v5, %v646_v47  ;;  %v615_v56 = vmul.f32 %v1997_v26, %v579_v1  ;;  %v616_v49 = vmul.f32 %v1997_v26, %v580_v27  ;;  %v582_v18 = vmul.f32 %v1984_v25, %v1847_v28 }
 0x1a0   :  { %v676_v10 = vpack.c.bf16 %v649_v29, %v648_v3  ;;  %v617_v30 = vmul.f32 %v1997_v26, %v581_v46  ;;  %v583_v23 = vmul.f32 %v1984_v25, %v1850_v44  ;;  %v650_v35 = vadd.f32 %v2006_v63, %v614_v20  ;;  %v1542_v29 = vld [vmem:[%s2339_s3 + $0x28] sm:$0xff]  }
 0x1a1   :  { %v651_v59 = vadd.f32 %v2006_v63, %v615_v56  ;;  %v584_v15 = vmul.f32 %v1984_v25, %v1853_v55  ;;  %v585_v14 = vmul.f32 %v1984_v25, %v1856_v58  ;;  %v652_v50 = vadd.f32 %v2006_v63, %v616_v49  ;;  %1472 = vmatprep.subr.bf16.mxu0 %v1542_v29 }
 0x1a2   :  { %v653_v34 = vadd.f32 %v2006_v63, %v617_v30  ;;  %v618_v28 = vmul.f32 %v1997_v26, %v582_v18  ;;  %v619_v40 = vmul.f32 %v1997_v26, %v583_v23  ;;  %v586_v55 = vmul.f32 %v1984_v25, %v1859_v2  ;;  %1473 = vmatpush3.bf16.msra.mxu0 %v1542_v29 }
 0x1a3   :  { %1435 = vmatmul.mubr.bf16.gmra.mrb[20].mxu1 %v673_v57  ;;  %v677_v39 = vpack.c.bf16 %v651_v59, %v650_v35  ;;  %v620_v42 = vmul.f32 %v1997_v26, %v584_v15  ;;  %v621_v45 = vmul.f32 %v1997_v26, %v585_v14  ;;  %v587_v58 = vmul.f32 %v1984_v25, %v1862_v6 }
 0x1a4   :  { %1438 = vmatprep.mubr.bf16.mxu1 %v674_v13  ;;  %v678_v44 = vpack.c.bf16 %v653_v34, %v652_v50  ;;  %v654_v52 = vadd.f32 %v2006_v63, %v618_v28  ;;  %v655_v48 = vadd.f32 %v2006_v63, %v619_v40  ;;  %v588_v60 = vmul.f32 %v1984_v25, %v1865_v11 }
 0x1a5   :  { %v589_v22 = vmul.f32 %v1984_v25, %v1867_v19  ;;  %v656_v51 = vadd.f32 %v2006_v63, %v620_v42  ;;  %v657_v7 = vadd.f32 %v2006_v63, %v621_v45  ;;  %v622_v2 = vmul.f32 %v1997_v26, %v586_v55 }
 0x1a6   :  { %v679_v9 = vpack.c.bf16 %v655_v48, %v654_v52  ;;  %v623_v32 = vmul.f32 %v1997_v26, %v587_v58  ;;  %v624_v33 = vmul.f32 %v1997_v26, %v588_v60  ;;  %v590_v11 = vmul.f32 %v1984_v25, %v1869_v4 }
 0x1a7   :  { %v680_v6 = vpack.c.bf16 %v657_v7, %v656_v51  ;;  %v625_v38 = vmul.f32 %v1997_v26, %v589_v22  ;;  %v591_v19 = vmul.f32 %v1984_v25, %v1871_v24  ;;  %v658_v12 = vadd.f32 %v2006_v63, %v622_v2 }
 0x1a8   :  { %v659_v43 = vadd.f32 %v2006_v63, %v623_v32  ;;  %v593_v31 = vmul.f32 %v1984_v25, %v1875_v8  ;;  %v592_v16 = vmul.f32 %v1984_v25, %v1873_v61  ;;  %v660_v54 = vadd.f32 %v2006_v63, %v624_v33 }
 0x1a9   :  { %v661_v57 = vadd.f32 %v2006_v63, %v625_v38  ;;  %v626_v4 = vmul.f32 %v1997_v26, %v590_v11  ;;  %v627_v21 = vmul.f32 %v1997_v26, %v591_v19  ;;  %v594_v8 = vmul.f32 %v1984_v25, %v1877_v36 }
 0x1aa   :  { %v681_v0 = vpack.c.bf16 %v659_v43, %v658_v12  ;;  %v628_v13 = vmul.f32 %v1997_v26, %v592_v16  ;;  %v629_v62 = vmul.f32 %v1997_v26, %v593_v31  ;;  %v595_v61 = vmul.f32 %v1984_v25, %v1879_v41 }
 0x1ab   :  { %1439 = vmatmul.mubr.bf16.gmra.mrb[24].mxu1 %v675_v17  ;;  %v682_v24 = vpack.c.bf16 %v661_v57, %v660_v54  ;;  %v662_v53 = vadd.f32 %v2006_v63, %v626_v4  ;;  %v663_v37 = vadd.f32 %v2006_v63, %v627_v21  ;;  %v630_v27 = vmul.f32 %v1997_v26, %v594_v8  ;;  %v1543_v17 = vld [vmem:[%s2339_s3 + $0x30] sm:$0xff]  }
 0x1ac   :  { %1442 = vmatprep.mubr.bf16.mxu1 %v676_v10  ;;  %v664_v1 = vadd.f32 %v2006_v63, %v628_v13  ;;  %v665_v47 = vadd.f32 %v2006_v63, %v629_v62  ;;  %v631_v46 = vmul.f32 %v1997_v26, %v595_v61  ;;  %1474 = vmatprep.subr.bf16.mxu0 %v1543_v17  ;;  %v1544_v26 = vld [vmem:[%s2339_s3 + $0x38] sm:$0xff]  }
 0x1ad   :  { %v683_v5 = vpack.c.bf16 %v663_v37, %v662_v53  ;;  %v666_v36 = vadd.f32 %v2006_v63, %v630_v27  ;;  %1475 = vmatpush3.bf16.msra.mxu0 %v1543_v17 }
 0x1ae   :  { %v684_v3 = vpack.c.bf16 %v665_v47, %v664_v1  ;;  %v667_v41 = vadd.f32 %v2006_v63, %v631_v46  ;;  %1476 = vmatprep.subr.bf16.mxu0 %v1544_v26  ;;  %v2136_v63 = vld [vmem:[%s2337_s4 + $0x3] ss:$0 sm:$0xff] }
 0x1b0   :  { %v685_v25 = vpack.c.bf16 %v667_v41, %v666_v36 }
 0x1b1   :  { %1477 = vmatpush3.bf16.msra.mxu0 %v1544_v26 }
 0x1b3   :  { %1443 = vmatmul.mubr.bf16.gmra.mrb[28].mxu1 %v677_v39 }
 0x1b4   :  { %1446 = vmatprep.mubr.bf16.mxu1 %v678_v44 }
 0x1bb   :  { %1447 = vmatmul.mubr.bf16.gmra.mrb[32].mxu1 %v679_v9 }
 0x1bc   :  { %1450 = vmatprep.mubr.bf16.mxu1 %v680_v6 }
 0x1c3   :  { %1451 = vmatmul.mubr.bf16.gmra.mrb[36].mxu1 %v681_v0 }
 0x1c4   :  { %1454 = vmatprep.mubr.bf16.mxu1 %v682_v24 }
 0x1cb   :  { %1455 = vmatmul.mubr.bf16.gmra.mrb[40].mxu1 %v683_v5 }
 0x1cc   :  { %1458 = vmatprep.mubr.bf16.mxu1 %v684_v3 }
 0x1d3   :  { %1459 = vmatmul.mubr.bf16.gmra.mrb[44].mxu1 %v685_v25 }
 0x26e   :  { %v1432_v20 = vpop.f32.mrb[16].mxu1 }
 0x26f   :  { %v797_v56 = vadd.f32 %v1432_v20, %v2136_v63  ;;  %v788_v10 = vpop.f32.mrb[17].mxu1 }
 0x270   :  { %v789_v49 = vadd.f32 %v2136_v63, %v788_v10  ;;  %v1433_v30 = vpop.f32.mrb[18].mxu1 }
 0x271   :  { %v917_v18 = vmul.f32 0.33, %v797_v56  ;;  %v800_v23 = vadd.f32 %v1433_v30, %v2136_v63  ;;  %v791_v35 = vpop.f32.mrb[19].mxu1 }
 0x272   :  { %v915_v59 = vmul.f32 0.33, %v789_v49  ;;  %v792_v15 = vadd.f32 %v2136_v63, %v791_v35 }
 0x273   :  { %v918_v14 = vmul.f32 0.33, %v800_v23  ;;  %v949_v34 = vmax.f32 %v797_v56, %v917_v18 }
 0x274   :  { %v916_v50 = vmul.f32 0.33, %v792_v15  ;;  %v947_v28 = vmax.f32 %v789_v49, %v915_v59 }
 0x275   :  { %v950_v39 = vmax.f32 %v800_v23, %v918_v14 }
 0x276   :  { %v948_v40 = vmax.f32 %v792_v15, %v916_v50  ;;  %v1436_v44 = vpop.f32.mrb[20].mxu1 }
 0x277   :  { %v980_v42 = vpack.c.bf16 %v950_v39, %v949_v34  ;;  %v813_v45 = vadd.f32 %v1436_v44, %v2136_v63  ;;  %v804_v55 = vpop.f32.mrb[21].mxu1 }
 0x278   :  { %v805_v58 = vadd.f32 %v2136_v63, %v804_v55  ;;  %v1437_v52 = vpop.f32.mrb[22].mxu1  ;;  %v979_v48 = vpack.c.bf16 %v948_v40, %v947_v28 }
 0x279   :  { %v921_v60 = vmul.f32 0.33, %v813_v45  ;;  %v816_v22 = vadd.f32 %v1437_v52, %v2136_v63  ;;  %v807_v51 = vpop.f32.mrb[23].mxu1 }
 0x27a   :  { %v919_v7 = vmul.f32 0.33, %v805_v58  ;;  %v808_v9 = vadd.f32 %v2136_v63, %v807_v51  ;;  %1478 = vmatprep.mubr.bf16.mxu0 %v979_v48 }
 0x27b   :  { %v922_v2 = vmul.f32 0.33, %v816_v22  ;;  %1479 = vmatmul.mubr.bf16.vlgmr.msra.gmra.mrb[16].mxu0 %v980_v42  ;;  %v953_v6 = vmax.f32 %v813_v45, %v921_v60 }
 0x27c   :  { %v920_v32 = vmul.f32 0.33, %v808_v9  ;;  %v951_v38 = vmax.f32 %v805_v58, %v919_v7 }
 0x27d   :  { %v954_v33 = vmax.f32 %v816_v22, %v922_v2 }
 0x27e   :  { %v952_v11 = vmax.f32 %v808_v9, %v920_v32  ;;  %v1440_v19 = vpop.f32.mrb[24].mxu1 }
 0x27f   :  { %v829_v12 = vadd.f32 %v1440_v19, %v2136_v63  ;;  %v820_v43 = vpop.f32.mrb[25].mxu1  ;;  %v982_v31 = vpack.c.bf16 %v954_v33, %v953_v6 }
 0x280   :  { %v821_v16 = vadd.f32 %v2136_v63, %v820_v43  ;;  %v1441_v54 = vpop.f32.mrb[26].mxu1  ;;  %v981_v57 = vpack.c.bf16 %v952_v11, %v951_v38 }
 0x281   :  { %v925_v0 = vmul.f32 0.33, %v829_v12  ;;  %v832_v4 = vadd.f32 %v1441_v54, %v2136_v63  ;;  %v823_v21 = vpop.f32.mrb[27].mxu1 }
 0x282   :  { %v923_v24 = vmul.f32 0.33, %v821_v16  ;;  %v824_v13 = vadd.f32 %v2136_v63, %v823_v21  ;;  %1482 = vmatprep.mubr.bf16.mxu0 %v981_v57 }
 0x283   :  { %v926_v62 = vmul.f32 0.33, %v832_v4  ;;  %1483 = vmatmul.mubr.bf16.gmra.mrb[20].mxu0 %v982_v31  ;;  %v957_v61 = vmax.f32 %v829_v12, %v925_v0 }
 0x284   :  { %v924_v8 = vmul.f32 0.33, %v824_v13  ;;  %v955_v37 = vmax.f32 %v821_v16, %v923_v24 }
 0x285   :  { %v958_v53 = vmax.f32 %v832_v4, %v926_v62 }
 0x286   :  { %v956_v1 = vmax.f32 %v824_v13, %v924_v8  ;;  %v1444_v47 = vpop.f32.mrb[28].mxu1 }
 0x287   :  { %v845_v5 = vadd.f32 %v1444_v47, %v2136_v63  ;;  %v836_v27 = vpop.f32.mrb[29].mxu1  ;;  %v984_v46 = vpack.c.bf16 %v958_v53, %v957_v61 }
 0x288   :  { %v837_v3 = vadd.f32 %v2136_v63, %v836_v27  ;;  %v1445_v36 = vpop.f32.mrb[30].mxu1  ;;  %v983_v41 = vpack.c.bf16 %v956_v1, %v955_v37 }
 0x289   :  { %v929_v25 = vmul.f32 0.33, %v845_v5  ;;  %v848_v29 = vadd.f32 %v1445_v36, %v2136_v63  ;;  %v839_v17 = vpop.f32.mrb[31].mxu1 }
 0x28a   :  { %v927_v26 = vmul.f32 0.33, %v837_v3  ;;  %v840_v20 = vadd.f32 %v2136_v63, %v839_v17  ;;  %1486 = vmatprep.mubr.bf16.mxu0 %v983_v41 }
 0x28b   :  { %v930_v56 = vmul.f32 0.33, %v848_v29  ;;  %1487 = vmatmul.mubr.bf16.gmra.mrb[24].mxu0 %v984_v46  ;;  %v961_v49 = vmax.f32 %v845_v5, %v929_v25 }
 0x28c   :  { %v928_v10 = vmul.f32 0.33, %v840_v20  ;;  %v959_v18 = vmax.f32 %v837_v3, %v927_v26 }
 0x28d   :  { %v962_v30 = vmax.f32 %v848_v29, %v930_v56 }
 0x28e   :  { %v960_v23 = vmax.f32 %v840_v20, %v928_v10  ;;  %v1448_v35 = vpop.f32.mrb[32].mxu1 }
 0x28f   :  { %v861_v59 = vadd.f32 %v1448_v35, %v2136_v63  ;;  %v852_v15 = vpop.f32.mrb[33].mxu1  ;;  %v986_v14 = vpack.c.bf16 %v962_v30, %v961_v49 }
 0x290   :  { %v853_v50 = vadd.f32 %v2136_v63, %v852_v15  ;;  %v1449_v34 = vpop.f32.mrb[34].mxu1  ;;  %v985_v39 = vpack.c.bf16 %v960_v23, %v959_v18 }
 0x291   :  { %v933_v28 = vmul.f32 0.33, %v861_v59  ;;  %v864_v40 = vadd.f32 %v1449_v34, %v2136_v63  ;;  %v855_v44 = vpop.f32.mrb[35].mxu1 }
 0x292   :  { %v931_v42 = vmul.f32 0.33, %v853_v50  ;;  %v856_v45 = vadd.f32 %v2136_v63, %v855_v44  ;;  %1490 = vmatprep.mubr.bf16.mxu0 %v985_v39 }
 0x293   :  { %v934_v55 = vmul.f32 0.33, %v864_v40  ;;  %1491 = vmatmul.mubr.bf16.gmra.mrb[28].mxu0 %v986_v14  ;;  %v965_v52 = vmax.f32 %v861_v59, %v933_v28 }
 0x294   :  { %v932_v58 = vmul.f32 0.33, %v856_v45  ;;  %v963_v60 = vmax.f32 %v853_v50, %v931_v42 }
 0x295   :  { %v966_v48 = vmax.f32 %v864_v40, %v934_v55 }
 0x296   :  { %v964_v22 = vmax.f32 %v856_v45, %v932_v58  ;;  %v1452_v51 = vpop.f32.mrb[36].mxu1  ;;  %v2173_v45 = vld [vmem:[%s2337_s4 + $0x4] ss:$0 sm:$0xff] }
 0x297   :  { %v877_v7 = vadd.f32 %v1452_v51, %v2136_v63  ;;  %v868_v9 = vpop.f32.mrb[37].mxu1  ;;  %v988_v2 = vpack.c.bf16 %v966_v48, %v965_v52 }
 0x298   :  { %v869_v32 = vadd.f32 %v2136_v63, %v868_v9  ;;  %v1453_v6 = vpop.f32.mrb[38].mxu1  ;;  %v987_v33 = vpack.c.bf16 %v964_v22, %v963_v60 }
 0x299   :  { %v937_v38 = vmul.f32 0.33, %v877_v7  ;;  %v880_v11 = vadd.f32 %v1453_v6, %v2136_v63  ;;  %v871_v19 = vpop.f32.mrb[39].mxu1 }
 0x29a   :  { %v935_v12 = vmul.f32 0.33, %v869_v32  ;;  %v872_v43 = vadd.f32 %v2136_v63, %v871_v19  ;;  %1494 = vmatprep.mubr.bf16.mxu0 %v987_v33 }
 0x29b   :  { %v938_v31 = vmul.f32 0.33, %v880_v11  ;;  %1495 = vmatmul.mubr.bf16.gmra.mrb[32].mxu0 %v988_v2  ;;  %v969_v54 = vmax.f32 %v877_v7, %v937_v38 }
 0x29c   :  { %v936_v16 = vmul.f32 0.33, %v872_v43  ;;  %v967_v0 = vmax.f32 %v869_v32, %v935_v12 }
 0x29d   :  { %v970_v57 = vmax.f32 %v880_v11, %v938_v31 }
 0x29e   :  { %v968_v4 = vmax.f32 %v872_v43, %v936_v16  ;;  %v1456_v21 = vpop.f32.mrb[40].mxu1 }
 0x29f   :  { %v893_v24 = vadd.f32 %v1456_v21, %v2136_v63  ;;  %v884_v13 = vpop.f32.mrb[41].mxu1  ;;  %v990_v62 = vpack.c.bf16 %v970_v57, %v969_v54 }
 0x2a0   :  { %v885_v8 = vadd.f32 %v2136_v63, %v884_v13  ;;  %v1457_v61 = vpop.f32.mrb[42].mxu1  ;;  %v989_v53 = vpack.c.bf16 %v968_v4, %v967_v0 }
 0x2a1   :  { %v941_v37 = vmul.f32 0.33, %v893_v24  ;;  %v896_v1 = vadd.f32 %v1457_v61, %v2136_v63  ;;  %v887_v47 = vpop.f32.mrb[43].mxu1 }
 0x2a2   :  { %v939_v5 = vmul.f32 0.33, %v885_v8  ;;  %v888_v27 = vadd.f32 %v2136_v63, %v887_v47  ;;  %1498 = vmatprep.mubr.bf16.mxu0 %v989_v53 }
 0x2a3   :  { %v942_v46 = vmul.f32 0.33, %v896_v1  ;;  %1499 = vmatmul.mubr.bf16.gmra.mrb[36].mxu0 %v990_v62  ;;  %v973_v36 = vmax.f32 %v893_v24, %v941_v37 }
 0x2a4   :  { %v940_v3 = vmul.f32 0.33, %v888_v27  ;;  %v971_v25 = vmax.f32 %v885_v8, %v939_v5 }
 0x2a5   :  { %v974_v41 = vmax.f32 %v896_v1, %v942_v46 }
 0x2a6   :  { %v972_v29 = vmax.f32 %v888_v27, %v940_v3  ;;  %v1460_v17 = vpop.f32.mrb[44].mxu1 }
 0x2a7   :  { %v909_v26 = vadd.f32 %v1460_v17, %v2136_v63  ;;  %v900_v20 = vpop.f32.mrb[45].mxu1  ;;  %v992_v56 = vpack.c.bf16 %v974_v41, %v973_v36 }
 0x2a8   :  { %v901_v10 = vadd.f32 %v2136_v63, %v900_v20  ;;  %v1461_v49 = vpop.f32.mrb[46].mxu1  ;;  %v991_v30 = vpack.c.bf16 %v972_v29, %v971_v25 }
 0x2a9   :  { %v945_v18 = vmul.f32 0.33, %v909_v26  ;;  %v912_v23 = vadd.f32 %v1461_v49, %v2136_v63  ;;  %v903_v35 = vpop.f32.mrb[47].mxu1 }
 0x2aa   :  { %v943_v59 = vmul.f32 0.33, %v901_v10  ;;  %v904_v15 = vadd.f32 %v2136_v63, %v903_v35  ;;  %1502 = vmatprep.mubr.bf16.mxu0 %v991_v30 }
 0x2ab   :  { %v946_v14 = vmul.f32 0.33, %v912_v23  ;;  %1503 = vmatmul.mubr.bf16.gmra.mrb[40].mxu0 %v992_v56  ;;  %v977_v34 = vmax.f32 %v909_v26, %v945_v18 }
 0x2ac   :  { %v944_v50 = vmul.f32 0.33, %v904_v15  ;;  %v975_v28 = vmax.f32 %v901_v10, %v943_v59 }
 0x2ad   :  { %v978_v39 = vmax.f32 %v912_v23, %v946_v14 }
 0x2ae   :  { %v976_v40 = vmax.f32 %v904_v15, %v944_v50 }
 0x2af   :  { %v994_v44 = vpack.c.bf16 %v978_v39, %v977_v34 }
 0x2b0   :  { %v993_v42 = vpack.c.bf16 %v976_v40, %v975_v28 }
 0x2b2   :  { %1506 = vmatprep.mubr.bf16.mxu0 %v993_v42 }
 0x2b3   :  { %1507 = vmatmul.mubr.bf16.gmra.mrb[44].mxu0 %v994_v44 }
 0x34e   :  { %v1480_v55 = vpop.f32.mrb[16].mxu0 }
 0x34f   :  { %v1106_v63 = vadd.f32 %v1480_v55, %v2173_v45  ;;  %v1097_v58 = vpop.f32.mrb[17].mxu0 }
 0x350   :  { %v1098_v52 = vadd.f32 %v2173_v45, %v1097_v58  ;;  %v1481_v48 = vpop.f32.mrb[18].mxu0 }
 0x351   :  { %1227 = vst.msk [vmem:[%s2340_s5 + $0x10] sm:$0xff] %vm1224_vm1, %v1106_v63  ;;  %v1109_v60 = vadd.f32 %v1481_v48, %v2173_v45  ;;  %v1100_v22 = vpop.f32.mrb[19].mxu0 }
 0x352   :  { %1225 = vst.msk [vmem:[%s2340_s5] sm:$0xff] %vm1224_vm1, %v1098_v52  ;;  %v1101_v51 = vadd.f32 %v2173_v45, %v1100_v22 }
 0x353   :  { %1228 = vst.msk [vmem:[%s2340_s5 + $0x18] sm:$0xff] %vm1224_vm1, %v1109_v60 }
 0x354   :  { %1226 = vst.msk [vmem:[%s2340_s5 + $0x8] sm:$0xff] %vm1224_vm1, %v1101_v51 }
 0x356   :  { %v1484_v7 = vpop.f32.mrb[20].mxu0 }
 0x357   :  { %v1122_v9 = vadd.f32 %v1484_v7, %v2173_v45  ;;  %v1113_v2 = vpop.f32.mrb[21].mxu0 }
 0x358   :  { %v1114_v32 = vadd.f32 %v2173_v45, %v1113_v2  ;;  %v1485_v6 = vpop.f32.mrb[22].mxu0 }
 0x359   :  { %1231 = vst.msk [vmem:[%s2340_s5 + $0x30] sm:$0xff] %vm1224_vm1, %v1122_v9  ;;  %v1125_v33 = vadd.f32 %v1485_v6, %v2173_v45  ;;  %v1116_v38 = vpop.f32.mrb[23].mxu0 }
 0x35a   :  { %1229 = vst.msk [vmem:[%s2340_s5 + $0x20] sm:$0xff] %vm1224_vm1, %v1114_v32  ;;  %v1117_v11 = vadd.f32 %v2173_v45, %v1116_v38 }
 0x35b   :  { %1232 = vst.msk [vmem:[%s2340_s5 + $0x38] sm:$0xff] %vm1224_vm1, %v1125_v33 }
 0x35c   :  { %1230 = vst.msk [vmem:[%s2340_s5 + $0x28] sm:$0xff] %vm1224_vm1, %v1117_v11 }
 0x35e   :  { %v1488_v19 = vpop.f32.mrb[24].mxu0 }
 0x35f   :  { %v1138_v12 = vadd.f32 %v1488_v19, %v2173_v45  ;;  %v1129_v43 = vpop.f32.mrb[25].mxu0 }
 0x360   :  { %v1130_v31 = vadd.f32 %v2173_v45, %v1129_v43  ;;  %v1489_v16 = vpop.f32.mrb[26].mxu0 }
 0x361   :  { %1235 = vst.msk [vmem:[%s2340_s5 + $0x50] sm:$0xff] %vm1224_vm1, %v1138_v12  ;;  %v1141_v54 = vadd.f32 %v1489_v16, %v2173_v45  ;;  %v1132_v57 = vpop.f32.mrb[27].mxu0 }
 0x362   :  { %1233 = vst.msk [vmem:[%s2340_s5 + $0x40] sm:$0xff] %vm1224_vm1, %v1130_v31  ;;  %v1133_v0 = vadd.f32 %v2173_v45, %v1132_v57 }
 0x363   :  { %1236 = vst.msk [vmem:[%s2340_s5 + $0x58] sm:$0xff] %vm1224_vm1, %v1141_v54 }
 0x364   :  { %1234 = vst.msk [vmem:[%s2340_s5 + $0x48] sm:$0xff] %vm1224_vm1, %v1133_v0 }
 0x366   :  { %v1492_v4 = vpop.f32.mrb[28].mxu0 }
 0x367   :  { %v1154_v21 = vadd.f32 %v1492_v4, %v2173_v45  ;;  %v1145_v24 = vpop.f32.mrb[29].mxu0 }
 0x368   :  { %v1146_v13 = vadd.f32 %v2173_v45, %v1145_v24  ;;  %v1493_v62 = vpop.f32.mrb[30].mxu0 }
 0x369   :  { %1239 = vst.msk [vmem:[%s2340_s5 + $0x70] sm:$0xff] %vm1224_vm1, %v1154_v21  ;;  %v1157_v8 = vadd.f32 %v1493_v62, %v2173_v45  ;;  %v1148_v61 = vpop.f32.mrb[31].mxu0 }
 0x36a   :  { %1237 = vst.msk [vmem:[%s2340_s5 + $0x60] sm:$0xff] %vm1224_vm1, %v1146_v13  ;;  %v1149_v53 = vadd.f32 %v2173_v45, %v1148_v61 }
 0x36b   :  { %1240 = vst.msk [vmem:[%s2340_s5 + $0x78] sm:$0xff] %vm1224_vm1, %v1157_v8 }
 0x36c   :  { %1238 = vst.msk [vmem:[%s2340_s5 + $0x68] sm:$0xff] %vm1224_vm1, %v1149_v53 }
 0x36e   :  { %v1496_v37 = vpop.f32.mrb[32].mxu0 }
 0x36f   :  { %v1170_v1 = vadd.f32 %v1496_v37, %v2173_v45  ;;  %v1161_v47 = vpop.f32.mrb[33].mxu0 }
 0x370   :  { %v1162_v5 = vadd.f32 %v2173_v45, %v1161_v47  ;;  %v1497_v27 = vpop.f32.mrb[34].mxu0 }
 0x371   :  { %1243 = vst.msk [vmem:[%s2340_s5 + $0x90] sm:$0xff] %vm1224_vm1, %v1170_v1  ;;  %v1173_v46 = vadd.f32 %v1497_v27, %v2173_v45  ;;  %v1164_v3 = vpop.f32.mrb[35].mxu0 }
 0x372   :  { %1241 = vst.msk [vmem:[%s2340_s5 + $0x80] sm:$0xff] %vm1224_vm1, %v1162_v5  ;;  %v1165_v36 = vadd.f32 %v2173_v45, %v1164_v3 }
 0x373   :  { %1244 = vst.msk [vmem:[%s2340_s5 + $0x98] sm:$0xff] %vm1224_vm1, %v1173_v46 }
 0x374   :  { %1242 = vst.msk [vmem:[%s2340_s5 + $0x88] sm:$0xff] %vm1224_vm1, %v1165_v36 }
 0x376   :  { %v1500_v41 = vpop.f32.mrb[36].mxu0 }
 0x377   :  { %v1186_v25 = vadd.f32 %v1500_v41, %v2173_v45  ;;  %v1177_v29 = vpop.f32.mrb[37].mxu0 }
 0x378   :  { %v1178_v17 = vadd.f32 %v2173_v45, %v1177_v29  ;;  %v1501_v26 = vpop.f32.mrb[38].mxu0 }
 0x379   :  { %1247 = vst.msk [vmem:[%s2340_s5 + $0xb0] sm:$0xff] %vm1224_vm1, %v1186_v25  ;;  %v1189_v20 = vadd.f32 %v1501_v26, %v2173_v45  ;;  %v1180_v56 = vpop.f32.mrb[39].mxu0 }
 0x37a   :  { %1245 = vst.msk [vmem:[%s2340_s5 + $0xa0] sm:$0xff] %vm1224_vm1, %v1178_v17  ;;  %v1181_v10 = vadd.f32 %v2173_v45, %v1180_v56 }
 0x37b   :  { %1248 = vst.msk [vmem:[%s2340_s5 + $0xb8] sm:$0xff] %vm1224_vm1, %v1189_v20 }
 0x37c   :  { %1246 = vst.msk [vmem:[%s2340_s5 + $0xa8] sm:$0xff] %vm1224_vm1, %v1181_v10 }
 0x37e   :  { %v1504_v49 = vpop.f32.mrb[40].mxu0 }
 0x37f   :  { %v1202_v30 = vadd.f32 %v1504_v49, %v2173_v45  ;;  %v1193_v18 = vpop.f32.mrb[41].mxu0 }
 0x380   :  { %v1194_v23 = vadd.f32 %v2173_v45, %v1193_v18  ;;  %v1505_v35 = vpop.f32.mrb[42].mxu0 }
 0x381   :  { %1251 = vst.msk [vmem:[%s2340_s5 + $0xd0] sm:$0xff] %vm1224_vm1, %v1202_v30  ;;  %v1205_v59 = vadd.f32 %v1505_v35, %v2173_v45  ;;  %v1196_v15 = vpop.f32.mrb[43].mxu0 }
 0x382   :  { %1249 = vst.msk [vmem:[%s2340_s5 + $0xc0] sm:$0xff] %vm1224_vm1, %v1194_v23  ;;  %v1197_v14 = vadd.f32 %v2173_v45, %v1196_v15 }
 0x383   :  { %1252 = vst.msk [vmem:[%s2340_s5 + $0xd8] sm:$0xff] %vm1224_vm1, %v1205_v59 }
 0x384   :  { %1250 = vst.msk [vmem:[%s2340_s5 + $0xc8] sm:$0xff] %vm1224_vm1, %v1197_v14 }
 0x386   :  { %v1508_v50 = vpop.f32.mrb[44].mxu0 }
 0x387   :  { %v1218_v34 = vadd.f32 %v1508_v50, %v2173_v45  ;;  %v1209_v39 = vpop.f32.mrb[45].mxu0 }
 0x388   :  { %v1210_v28 = vadd.f32 %v2173_v45, %v1209_v39  ;;  %v1509_v40 = vpop.f32.mrb[46].mxu0 }
 0x389   :  { %1255 = vst.msk [vmem:[%s2340_s5 + $0xf0] sm:$0xff] %vm1224_vm1, %v1218_v34  ;;  %v1221_v44 = vadd.f32 %v1509_v40, %v2173_v45  ;;  %v1212_v42 = vpop.f32.mrb[47].mxu0 }
 0x38a   :  { %1253 = vst.msk [vmem:[%s2340_s5 + $0xe0] sm:$0xff] %vm1224_vm1, %v1210_v28  ;;  %v1213_v55 = vadd.f32 %v2173_v45, %v1212_v42 }
 0x38b   :  { %1256 = vst.msk [vmem:[%s2340_s5 + $0xf8] sm:$0xff] %vm1224_vm1, %v1221_v44 }
 0x38c   :  { %1254 = vst.msk [vmem:[%s2340_s5 + $0xe8] sm:$0xff] %vm1224_vm1, %v1213_v55 }

</bundles_post_ra>
